<compile_context>
chip_gen: v6e
topology: v6e:2x2x1
jax: 0.10.0
libtpu: 0.0.40
codegen_flags: <defaults>
</compile_context>

<pallas_src>
from functools import partial

import jax
import jax.numpy as jnp
from jax import lax
from jax.experimental import pallas as pl
from jax.experimental.pallas import tpu as pltpu

BN_EPS = 1e-5


def _round_up(x, m):
    return (x + m - 1) // m * m


# ---------------------------------------------------------------------------
# Pass 1 (tiny, grid=(1,)): per-map projection + analytic BatchNorm stats,
# emitted already lane-tiled g times so pass 2 is lane-dense.
# NOTE: for very large M / spatial extents this pass should be tiled over M
# (grid over M with scratch accumulators for sum(c*y) / sum(c*y^2)) to respect
# the 64 MiB/TC VMEM on v7x; at module-typical sizes everything fits easily.
# ---------------------------------------------------------------------------
def proj_map_kernel(nm_ref, w_ref, b_ref, gamma_ref, beta_ref, counts_ref,
                    proj_ref, *, n_total, g):
    # amax over the flattened (lane-dense) spatial axis: (M, C_mem, H*W) -> (M, C_mem)
    nv = jnp.max(nm_ref[...].astype(jnp.float32), axis=-1)

    # Linear on the M unique maps: contract nv axis 1 with weight (dim, C_mem) axis 1
    # (weight passed untransposed; no extra HBM transpose pass).
    y = lax.dot_general(
        nv, w_ref[...].astype(jnp.float32),
        dimension_numbers=(((1,), (1,)), ((), ())),
        preferred_element_type=jnp.float32,
    ) + b_ref[...]                                            # (M, dim)

    # Exact full-batch (N-row) BatchNorm statistics from per-map counts:
    # repeated rows are identical, so count-weighted sums over M reproduce the
    # N-row stats exactly.  (counts cast to f32: exact while counts < 2^24.)
    cnt = counts_ref[...]                                     # (M, 1) f32
    inv_n = jnp.float32(1.0 / n_total)
    mean = jnp.sum(cnt * y, axis=0, keepdims=True) * inv_n    # (1, dim)
    var = jnp.sum(cnt * (y - mean) ** 2, axis=0, keepdims=True) * inv_n  # biased
    inv_std = lax.rsqrt(var + jnp.float32(BN_EPS))

    norm = (y - mean) * inv_std * gamma_ref[...] + beta_ref[...]   # (M, dim)
    if g > 1:
        # Tile g copies along the lane axis so pass 2 works on 128-lane slabs.
        norm = jnp.concatenate([norm] * g, axis=-1)                # (M, g*dim)
    proj_ref[...] = norm.astype(proj_ref.dtype)


# ---------------------------------------------------------------------------
# Pass 2 (streaming, memory-bound): lane-dense residual add.
# Each folded row carries g original rows; the repeat_interleave "gather" is a
# static VPU select chain over the contiguous per-map row ranges.
# ---------------------------------------------------------------------------
def stream_kernel(proj_ref, emb_ref, out_ref, *, g, dim, starts, ends):
    tile_r, gdim = out_ref.shape
    r0 = pl.program_id(0) * tile_r

    # Original (pre-fold) row id of every element in the block: folded row r holds
    # original rows r*g .. r*g+g-1, one per dim-lane group.
    row = lax.broadcasted_iota(jnp.int32, (tile_r, gdim), 0)
    lane = lax.broadcasted_iota(jnp.int32, (tile_r, gdim), 1)
    gid = (r0 + row) * g + lane // dim

    pt = proj_ref[...]                                        # (M, g*dim) resident
    acc = emb_ref[...].astype(jnp.float32)
    # starts/ends are compile-time Python ints -> immediates in the compares.
    for m in range(pt.shape[0]):
        sel = (gid >= starts[m]) & (gid < ends[m])
        acc = acc + jnp.where(sel, pt[m:m + 1, :], 0.0)
    out_ref[...] = acc.astype(out_ref.dtype)


# ---------------------------------------------------------------------------
# Wrapper
# ---------------------------------------------------------------------------
def linear_projection(embeddings, noise_maps, num_embs_per_map,
                      weight, bias, gamma, beta):
    """embeddings: (N, dim); noise_maps: (M, C_mem, H, W) NCHW;
       weight: (dim, C_mem); bias/gamma/beta: (dim,); num_embs_per_map: list[int]."""
    N, dim = embeddings.shape
    M, c_mem, H, W = noise_maps.shape

    counts = [int(c) for c in num_embs_per_map]
    assert len(counts) == M, "num_embs_per_map must have one entry per noise map"
    assert sum(counts) == N, "sum(num_embs_per_map) must equal embeddings.shape[0]"

    # Contiguous row ranges produced by repeat_interleave (static Python ints).
    starts, ends, off = [], [], 0
    for c in counts:
        starts.append(off)
        off += c
        ends.append(off)
    counts_f = jnp.asarray(counts, dtype=jnp.float32).reshape(M, 1)

    # Lane-dense folding factor: pack g = 128//dim original rows per 128-lane row.
    g = 128 // dim if (dim < 128 and 128 % dim == 0) else 1
    if g > 1 and N % g != 0:
        g = 1                       # fallback: still correct, just lane-sparse
    gdim = g * dim
    R = N // g

    # Pure row-major reshapes (no transpose) => no HBM copies.
    nm = noise_maps.reshape(M, c_mem, H * W)
    emb2 = embeddings.reshape(R, gdim)
    b2 = bias.reshape(1, dim)
    g2 = gamma.reshape(1, dim)
    bt2 = beta.reshape(1, dim)

    def full_spec(shape):
        nd = len(shape)
        return pl.BlockSpec(shape, lambda i, nd=nd: (0,) * nd)

    # ---- pass 1: (M, g*dim) normalized, lane-tiled per-map projection ----
    proj_tiled = pl.pallas_call(
        partial(proj_map_kernel, n_total=N, g=g),
        grid=(1,),
        in_specs=[
            full_spec(nm.shape),
            full_spec(weight.shape),
            full_spec(b2.shape),
            full_spec(g2.shape),
            full_spec(bt2.shape),
            full_spec(counts_f.shape),
        ],
        out_specs=full_spec((M, gdim)),
        out_shape=jax.ShapeDtypeStruct((M, gdim), jnp.float32),
        compiler_params=pltpu.CompilerParams(
            dimension_semantics=("arbitrary",)),
    )(nm, weight, b2, g2, bt2, counts_f)

    # ---- pass 2: stream embeddings in lane-dense (TILE_R, g*dim) blocks ----
    # ~0.5–1 MiB per block, while keeping >=4 grid steps when R allows so both
    # v7x TensorCores get work on this memory-bound stream.
    if R >= 8:
        TILE_R = max(8, min(2048, _round_up(pl.cdiv(R, 4), 8)))
    else:
        TILE_R = R                  # tiny input: single full block
    grid_r = pl.cdiv(R, TILE_R)     # ragged last block: OOB writes are discarded

    out2 = pl.pallas_call(
        partial(stream_kernel, g=g, dim=dim,
                starts=tuple(starts), ends=tuple(ends)),
        grid=(grid_r,),
        in_specs=[
            pl.BlockSpec((M, gdim), lambda i: (0, 0)),          # proj (resident)
            pl.BlockSpec((TILE_R, gdim), lambda i: (i, 0)),     # embeddings (streamed)
        ],
        out_specs=pl.BlockSpec((TILE_R, gdim), lambda i: (i, 0)),
        out_shape=jax.ShapeDtypeStruct((R, gdim), embeddings.dtype),
        compiler_params=pltpu.CompilerParams(
            dimension_semantics=("parallel",),
            vmem_limit_bytes=32 * 1024 * 1024),                 # fits v7x 64 MiB/TC
    )(proj_tiled, emb2)

    return out2.reshape(N, dim)


# ---------------------------------------------------------------------------
# Pure-JAX reference (mirrors the PyTorch forward in train mode).
# ---------------------------------------------------------------------------
def reference(embeddings, noise_maps, num_embs_per_map, weight, bias, gamma, beta):
    nv = jnp.max(noise_maps, axis=(2, 3))
    counts = jnp.asarray(num_embs_per_map, dtype=jnp.int32)
    nv_rep = jnp.repeat(nv, counts, axis=0,
                        total_repeat_length=int(sum(num_embs_per_map)))
    y = nv_rep @ weight.T + bias
    mean = jnp.mean(y, axis=0, keepdims=True)
    var = jnp.mean((y - mean) ** 2, axis=0, keepdims=True)   # biased, as in BN training
    y_hat = (y - mean) / jnp.sqrt(var + BN_EPS)
    return embeddings + y_hat * gamma + beta


if __name__ == "__main__":
    key = jax.random.PRNGKey(0)
    k_emb, k_nm, k_w = jax.random.split(key, 3)

    # Small shapes consistent with the module:
    dim = 32            # output embedding dim
    c_mem = 16          # memery_channels
    M, H, W = 2, 8, 8   # number of noise maps, spatial size
    num_embs_per_map = [3, 5]
    N = sum(num_embs_per_map)

    embeddings = jax.random.normal(k_emb, (N, dim), dtype=jnp.float32)
    noise_maps = jax.random.normal(k_nm, (M, c_mem, H, W), dtype=jnp.float32)

    # Deterministic synthetic parameters (matching reset_parameters intent):
    weight = 0.01 * jax.random.normal(k_w, (dim, c_mem), dtype=jnp.float32)
    bias = jnp.zeros((dim,), dtype=jnp.float32)
    gamma = jnp.ones((dim,), dtype=jnp.float32)   # BatchNorm1d weight
    beta = jnp.zeros((dim,), dtype=jnp.float32)   # BatchNorm1d bias

    out = linear_projection(embeddings, noise_maps, num_embs_per_map,
                            weight, bias, gamma, beta)
    jax.block_until_ready(out)

    ref = reference(embeddings, noise_maps, num_embs_per_map,
                    weight, bias, gamma, beta)
    assert out.shape == (N, dim) and out.dtype == jnp.float32
    assert jnp.max(jnp.abs(out - ref)) < 1e-3, "kernel output mismatch vs reference"
    print("KERNEL_OK")
</pallas_src>

<mosaic_0001>
module attributes {stable_mosaic.version = 11 : i64} {
  func.func @proj_map_kernel(%arg0: i32, %arg1: memref<2x16x64xf32, #tpu.memory_space<vmem>>, %arg2: memref<32x16xf32, #tpu.memory_space<vmem>>, %arg3: memref<1x32xf32, #tpu.memory_space<vmem>>, %arg4: memref<1x32xf32, #tpu.memory_space<vmem>>, %arg5: memref<1x32xf32, #tpu.memory_space<vmem>>, %arg6: memref<2x1xf32, #tpu.memory_space<vmem>>, %arg7: memref<2x128xf32, #tpu.memory_space<vmem>>) attributes {dimension_semantics = [#tpu.dimension_semantics<arbitrary>], iteration_bounds = array<i64: 1>, scalar_prefetch = 0 : i64, scratch_operands = 0 : i64, tpu.core_type = #tpu.core_type<tc>, window_params = [{pipeline_mode = #tpu.pipeline_mode<synchronous>, transform_indices = @transform_0, window_bounds = array<i64: 2, 16, 64>}, {pipeline_mode = #tpu.pipeline_mode<synchronous>, transform_indices = @transform_1, window_bounds = array<i64: 32, 16>}, {pipeline_mode = #tpu.pipeline_mode<synchronous>, transform_indices = @transform_2, window_bounds = array<i64: 1, 32>}, {pipeline_mode = #tpu.pipeline_mode<synchronous>, transform_indices = @transform_3, window_bounds = array<i64: 1, 32>}, {pipeline_mode = #tpu.pipeline_mode<synchronous>, transform_indices = @transform_4, window_bounds = array<i64: 1, 32>}, {pipeline_mode = #tpu.pipeline_mode<synchronous>, transform_indices = @transform_5, window_bounds = array<i64: 2, 1>}, {pipeline_mode = #tpu.pipeline_mode<synchronous>, transform_indices = @transform_6, window_bounds = array<i64: 2, 128>}]} {
    %c0 = arith.constant 0 : index
    %c0_0 = arith.constant 0 : index
    %c0_1 = arith.constant 0 : index
    %0 = vector.load %arg1[%c0, %c0_0, %c0_1] : memref<2x16x64xf32, #tpu.memory_space<vmem>>, vector<2x16x64xf32>
    %cst = arith.constant dense<0xFF800000> : vector<2x16xf32>
    %1 = vector.multi_reduction <maximumf>, %0, %cst [2] : vector<2x16x64xf32> to vector<2x16xf32>
    %c0_2 = arith.constant 0 : index
    %c0_3 = arith.constant 0 : index
    %2 = vector.load %arg2[%c0_2, %c0_3] : memref<32x16xf32, #tpu.memory_space<vmem>>, vector<32x16xf32>
    %cst_4 = arith.constant dense<0.000000e+00> : vector<2x32xf32>
    %3 = tpu.matmul %1, %2, %cst_4 {dimension_numbers = #tpu.dot_dimension_numbers<[1], [1], [0], [0], [0, 0, 1, 0], [], []>} : vector<2x16xf32>, vector<32x16xf32>, vector<2x32xf32> -> vector<2x32xf32>
    %c0_5 = arith.constant 0 : index
    %c0_6 = arith.constant 0 : index
    %4 = vector.load %arg3[%c0_5, %c0_6] : memref<1x32xf32, #tpu.memory_space<vmem>>, vector<1x32xf32>
    %5 = vector.broadcast %4 : vector<1x32xf32> to vector<2x32xf32>
    %6 = arith.addf %3, %5 : vector<2x32xf32>
    %c0_7 = arith.constant 0 : index
    %c0_8 = arith.constant 0 : index
    %7 = vector.load %arg6[%c0_7, %c0_8] : memref<2x1xf32, #tpu.memory_space<vmem>>, vector<2x1xf32>
    %8 = vector.broadcast %7 : vector<2x1xf32> to vector<2x32xf32>
    %9 = arith.mulf %8, %6 : vector<2x32xf32>
    %cst_9 = arith.constant dense<0.000000e+00> : vector<32xf32>
    %10 = vector.multi_reduction <add>, %9, %cst_9 [0] : vector<2x32xf32> to vector<32xf32>
    %11 = vector.shape_cast %10 : vector<32xf32> to vector<1x32xf32>
    %cst_10 = arith.constant 1.250000e-01 : f32
    %12 = vector.broadcast %cst_10 : f32 to vector<1x32xf32>
    %13 = arith.mulf %11, %12 : vector<1x32xf32>
    %14 = vector.broadcast %13 : vector<1x32xf32> to vector<2x32xf32>
    %15 = arith.subf %6, %14 : vector<2x32xf32>
    %16 = arith.mulf %15, %15 : vector<2x32xf32>
    %17 = vector.broadcast %7 : vector<2x1xf32> to vector<2x32xf32>
    %18 = arith.mulf %17, %16 : vector<2x32xf32>
    %cst_11 = arith.constant dense<0.000000e+00> : vector<32xf32>
    %19 = vector.multi_reduction <add>, %18, %cst_11 [0] : vector<2x32xf32> to vector<32xf32>
    %20 = vector.shape_cast %19 : vector<32xf32> to vector<1x32xf32>
    %cst_12 = arith.constant 1.250000e-01 : f32
    %21 = vector.broadcast %cst_12 : f32 to vector<1x32xf32>
    %22 = arith.mulf %20, %21 : vector<1x32xf32>
    %cst_13 = arith.constant 9.99999974E-6 : f32
    %23 = vector.broadcast %cst_13 : f32 to vector<1x32xf32>
    %24 = arith.addf %22, %23 : vector<1x32xf32>
    %25 = math.rsqrt %24 : vector<1x32xf32>
    %26 = vector.broadcast %13 : vector<1x32xf32> to vector<2x32xf32>
    %27 = arith.subf %6, %26 : vector<2x32xf32>
    %28 = vector.broadcast %25 : vector<1x32xf32> to vector<2x32xf32>
    %29 = arith.mulf %27, %28 : vector<2x32xf32>
    %c0_14 = arith.constant 0 : index
    %c0_15 = arith.constant 0 : index
    %30 = vector.load %arg4[%c0_14, %c0_15] : memref<1x32xf32, #tpu.memory_space<vmem>>, vector<1x32xf32>
    %31 = vector.broadcast %30 : vector<1x32xf32> to vector<2x32xf32>
    %32 = arith.mulf %29, %31 : vector<2x32xf32>
    %c0_16 = arith.constant 0 : index
    %c0_17 = arith.constant 0 : index
    %33 = vector.load %arg5[%c0_16, %c0_17] : memref<1x32xf32, #tpu.memory_space<vmem>>, vector<1x32xf32>
    %34 = vector.broadcast %33 : vector<1x32xf32> to vector<2x32xf32>
    %35 = arith.addf %32, %34 : vector<2x32xf32>
    %36 = tpu.concatenate %35, %35, %35, %35 in 1 : vector<2x32xf32>, vector<2x32xf32>, vector<2x32xf32>, vector<2x32xf32> -> vector<2x128xf32>
    %c0_18 = arith.constant 0 : index
    %c0_19 = arith.constant 0 : index
    %37 = vector.load %arg7[%c0_18, %c0_19] : memref<2x128xf32, #tpu.memory_space<vmem>>, vector<2x128xf32>
    tpu.vector_store %arg7[%c0_18, %c0_19], %36 {strides = array<i32>} : memref<2x128xf32, #tpu.memory_space<vmem>>, vector<2x128xf32>,
    return
  }
  func.func @transform_0(%arg0: i32) -> (i32, i32, i32) {
    %c0_i32 = arith.constant 0 : i32
    %c0_i32_0 = arith.constant 0 : i32
    %c0_i32_1 = arith.constant 0 : i32
    %c0_i32_2 = arith.constant 0 : i32
    return %c0_i32, %c0_i32_0, %c0_i32_1 : i32, i32, i32
  }
  func.func @transform_1(%arg0: i32) -> (i32, i32) {
    %c0_i32 = arith.constant 0 : i32
    %c0_i32_0 = arith.constant 0 : i32
    %c0_i32_1 = arith.constant 0 : i32
    return %c0_i32, %c0_i32_0 : i32, i32
  }
  func.func @transform_2(%arg0: i32) -> (i32, i32) {
    %c0_i32 = arith.constant 0 : i32
    %c0_i32_0 = arith.constant 0 : i32
    %c0_i32_1 = arith.constant 0 : i32
    return %c0_i32, %c0_i32_0 : i32, i32
  }
  func.func @transform_3(%arg0: i32) -> (i32, i32) {
    %c0_i32 = arith.constant 0 : i32
    %c0_i32_0 = arith.constant 0 : i32
    %c0_i32_1 = arith.constant 0 : i32
    return %c0_i32, %c0_i32_0 : i32, i32
  }
  func.func @transform_4(%arg0: i32) -> (i32, i32) {
    %c0_i32 = arith.constant 0 : i32
    %c0_i32_0 = arith.constant 0 : i32
    %c0_i32_1 = arith.constant 0 : i32
    return %c0_i32, %c0_i32_0 : i32, i32
  }
  func.func @transform_5(%arg0: i32) -> (i32, i32) {
    %c0_i32 = arith.constant 0 : i32
    %c0_i32_0 = arith.constant 0 : i32
    %c0_i32_1 = arith.constant 0 : i32
    return %c0_i32, %c0_i32_0 : i32, i32
  }
  func.func @transform_6(%arg0: i32) -> (i32, i32) {
    %c0_i32 = arith.constant 0 : i32
    %c0_i32_0 = arith.constant 0 : i32
    %c0_i32_1 = arith.constant 0 : i32
    return %c0_i32, %c0_i32_0 : i32, i32
  }
}

</mosaic_0001>

<bundles_post_ra>
// kernel: tpu_custom_call.1
= control target key start
LH: loop header
LB: loop body
LE: loop exit
PB: predicated region body
PF: predicated region fallthrough
CT: control target
= control target key end

     0   :  { %vm28_vm0 = vcmask 523264   ;;  %vm80_vm1 = vcmask 130048   ;;  %v297_v6 = vmov 0.0   ;;  %s388_s0 = inlined_call_operand.vmem [shape: f32[2,16,64], index: 0, kind: input, shape index: {}]   ;;  %s389_s1 = inlined_call_operand.vmem [shape: f32[32,16], index: 1, kind: input, shape index: {}]   ;;  %s390_s2 = inlined_call_operand.vmem [shape: f32[1,32], index: 2, kind: input, shape index: {}]   ;;  %s391_s3 = inlined_call_operand.vmem [shape: f32[1,32], index: 3, kind: input, shape index: {}]   ;;  %s392_s4 = inlined_call_operand.vmem [shape: f32[1,32], index: 4, kind: input, shape index: {}]   ;;  %s393_s5 = inlined_call_operand.vmem [shape: f32[2,1], index: 5, kind: input, shape index: {}]   ;;  %s394_s6 = inlined_call_operand.hbm [shape: f32[2,128], index: 6, kind: output, shape index: {}]  }
   0x1   :  { %v26_v0 = vld [vmem:[%s388_s0 + $0x10] sm:$0xff]  ;;  %v24_v1 = vld [vmem:[%s388_s0] sm:$0xff]  ;;  %v27_v2 = vld [vmem:[%s388_s0 + $0x18] sm:$0xff]  ;;  %254 = vmatprep.subr.mxu0 %v297_v6 }
   0x2   :  { %v35_v3 = vsel %vm28_vm0, %v26_v0, -inf  ;;  %v29_v4 = vsel %vm28_vm0, %v24_v1, -inf  ;;  %v25_v5 = vld [vmem:[%s388_s0 + $0x8] sm:$0xff]  ;;  %v44_v7 = vld [vmem:[%s389_s1 + $0x18] sm:$0xff] }
   0x3   :  { %36 = vmax.xlane.f32.xlu1 %v35_v3  ;;  %30 = vmax.xlane.f32.xlu0 %v29_v4 }
   0x4   :  { %11 = vsyncpa [#allocation3], 0  ;;  %v38_v8 = vsel %vm28_vm0, %v27_v2, -inf  ;;  %v32_v9 = vsel %vm28_vm0, %v25_v5, -inf  ;;  %255 = vmatpush3.xpose.msk.msra.mxu0 %vm80_vm1, %v44_v7  ;;  %v43_v10 = vld [vmem:[%s389_s1 + $0x10] sm:$0xff]  ;;  %v42_v11 = vld [vmem:[%s389_s1 + $0x8] sm:$0xff]  ;;  %v56_v15 = vlaneseq }
   0x5   :  { %256 = vmatprep.subr.mxu0 %v297_v6  ;;  %v41_v12 = vld [vmem:[%s389_s1] sm:$0xff]  ;;  %vm298_vm2 = vmmov 0   ;;  %v299_v13 = vmov 0   ;;  %vm67_vm3 = vcmask 130112   ;;  %vm78_vm4 = vcmask 1041409   ;;  %s300_s17 = smov 32  }
   0x6   :  { %262 = vmatprep.mubr.msk.f32.mxu0 %vm298_vm2, %v297_v6  ;;  %272 = vset.pattern.permute.xlu0 %v299_v13  ;;  %v165_v14 = vld [vmem:[%s393_s5] sm:$0x3]  ;;  %v57_v16 = vand.u32 127, %v56_v15  ;;  %v59_v17 = vshrl.u32 %v56_v15, 7  ;;  %vm172_vm5 = vcmask 254976   ;;  %s301_s18 = smov 64  }
   0x7   :  { %39 = vmax.xlane.f32.xlu1 %v38_v8  ;;  %33 = vmax.xlane.f32.xlu0 %v32_v9  ;;  %v241_v32 = vld [vmem:[%s390_s2] ss:$0 sm:$0xff]  ;;  %s302_s19 = smov 96   ;;  %vm221_vm6 = vcmask 261120   ;;  %s303_s20 = smov [#allocation2]   ;;  %vm224_vm7 = vcmask 785408  }
   0x8   :  { %257 = vmatpush3.xpose.msk.msra.mxu0 %vm80_vm1, %v43_v10  ;;  %v62_v18 = vadd.s32 4294967288, %v57_v16  ;;  %v60_v21 = vsub.s32 %v57_v16, %v59_v17  ;;  %v247_v59 = vld [vmem:[%s391_s3] ss:$0 sm:$0xff]  ;;  %s233_s21 = sshll.u32 %s303_s20, 4  ;;  %s234_s21 = int_to_ptr.vmem [resolvable:$true] %s233_s21 }
   0x9   :  { %258 = vmatprep.subr.mxu0 %v297_v6  ;;  %v248_v61 = vld [vmem:[%s392_s4] ss:$0 sm:$0xff]  ;;  %s275_s3 = scalar_lea.vmem %s234_s21, 32  ;;  %p280_p1 = scmp.lt.s32.totalorder %s234_s21, %s234_s21 }
   0xa   :  { %v65_v22 = vsub.s32 %v62_v18, %v59_v17  ;;  %p276_p0 = scmp.ne.s32.totalorder %s234_s21, %s275_s3  ;;  %p281_p2 = scmp.lt.s32.totalorder %s275_s3, %s275_s3 }
   0xc   :  { %259 = vmatpush3.xpose.msk.msra.mxu0 %vm80_vm1, %v42_v11  ;;  %p282_p3 = por %p281_p2, %p280_p1 }
   0xd   :  { %260 = vmatprep.subr.mxu0 %v297_v6 }
   0xe   :  { %p283_p4 = pnand %p282_p3, %p276_p0 }
  0x10   :  { %261 = vmatpush3.xpose.msk.msra.mxu0 %vm80_vm1, %v41_v12 }
  0x1d   :  { %168 = vperm.xlu0 %272, %v165_v14  }
  0x8c   :  { %v37_v19 = vpop.xlane.xlu1 %36  ;;  %v31_v20 = vpop.xlane.xlu0 %30 }
  0x8d   :  { %v72_v25 = vrot.slane %v37_v19, %v60_v21  ;;  %v61_v26 = vrot.slane %v31_v20, %v60_v21 }
  0x90   :  { %v40_v23 = vpop.xlane.xlu1 %39  ;;  %v34_v24 = vpop.xlane.xlu0 %33 }
  0x91   :  { %v76_v27 = vrot.slane %v40_v23, %v65_v22  ;;  %v66_v28 = vrot.slane %v34_v24, %v65_v22 }
  0x93   :  { %v77_v29 = vsel %vm67_vm3, %v76_v27, %v72_v25  ;;  %v68_v30 = vsel %vm67_vm3, %v66_v28, %v61_v26 }
  0x94   :  { %v79_v31 = vsel %vm78_vm4, %v77_v29, %v68_v30 }
  0x95   :  { %263 = vmatmul.mubr.msk.f32.vlgmr.msra.gmra.mxu0 %vm80_vm1, %v79_v31 }
  0x98   :  { %v169_v34 = vpop.permute.xlu0 %168 }
 0x155   :  { %v161_v33 = vpop.f32.mrf.mxu0 }
 0x156   :  { %v162_v35 = vadd.f32 %v241_v32, %v161_v33 }
 0x157   :  { %v264_v36 = vpop.f32.mrf.mxu0 }
 0x158   :  { %v171_v37 = vmul.f32 %v169_v34, %v162_v35 }
 0x15a   :  { %v173_v38 = vsel %vm172_vm5, %v171_v37, 0.0 }
 0x15b   :  { %v174_v39 = vrot.slane %v173_v38, 4 }
 0x15d   :  { %v175_v40 = vadd.f32 %v174_v39, %v173_v38 }
 0x15f   :  { %v176_v41 = vrot.slane %v175_v40, 2 }
 0x161   :  { %v177_v42 = vadd.f32 %v176_v41, %v175_v40 }
 0x163   :  { %v178_v43 = vrot.slane %v177_v42, 1 }
 0x165   :  { %v179_v44 = vadd.f32 %v178_v43, %v177_v42 }
 0x167   :  { %v180_v45 = vmul.f32 0.125, %v179_v44 }
 0x169   :  { %v181_v46 = vsub.f32 %v162_v35, %v180_v45 }
 0x16b   :  { %v182_v47 = vmul.f32 %v181_v46, %v181_v46 }
 0x16d   :  { %v183_v48 = vmul.f32 %v182_v47, %v169_v34 }
 0x16f   :  { %v184_v49 = vsel %vm172_vm5, %v183_v48, 0.0 }
 0x170   :  { %v185_v50 = vrot.slane %v184_v49, 4 }
 0x172   :  { %v186_v51 = vadd.f32 %v185_v50, %v184_v49 }
 0x174   :  { %v187_v52 = vrot.slane %v186_v51, 2 }
 0x176   :  { %v188_v53 = vadd.f32 %v187_v52, %v186_v51 }
 0x178   :  { %v189_v54 = vrot.slane %v188_v53, 1 }
 0x17a   :  { %v190_v55 = vadd.f32 %v189_v54, %v188_v53 }
 0x17c   :  { %v191_v56 = vmul.f32 0.125, %v190_v55 }
 0x17e   :  { %v192_v57 = vadd.f32 1e-05, %v191_v56 }
 0x180   :  { %273 = vrsqrt.f32 %v192_v57 }
 0x18d   :  { %v274_v58 = vpop.eup %273 }
 0x18e   :  { %v194_v60 = vmul.f32 %v274_v58, %v181_v46 }
 0x190   :  { %v202_v62 = vmul.f32 %v247_v59, %v194_v60 }
 0x192   :  { %v210_v63 = vadd.f32 %v248_v61, %v202_v62 }
 0x194   :  { %212 = vrot.lane.b32.xlu1 %v210_v63, %s300_s17 }
 0x198   :  { %215 = vrot.lane.b32.xlu1 %v210_v63, %s301_s18 }
 0x19c   :  { %218 = vrot.lane.b32.xlu1 %v210_v63, %s302_s19 }
 0x206   :  { %v213_v0 = vpop.permute.xlu1 %212 }
 0x207   :  { %v222_v2 = vsel %vm221_vm6, %v210_v63, %v213_v0 }
 0x20a   :  { %v216_v1 = vpop.permute.xlu1 %215 }
 0x20b   :  { %v223_v3 = vsel %vm28_vm0, %v222_v2, %v216_v1 }
 0x20e   :  { %v219_v4 = vpop.permute.xlu1 %218 }
 0x20f   :  { %v225_v5 = vsel %vm224_vm7, %v223_v3, %v219_v4 }
 0x210   :  { %226 = vst [vmem:[#allocation2] sm:$0x3] %v225_v5 }
 0x211   :  { %286 = shalt.err (!%p283_p4)
}
 0x212   :  { %236 = dma.vmem_to_hbm [thread:$0]  %s234_s21, 32, %s394_s6, [#allocation3]  }
 0x213   :  { %295 = dma.done.wait [#allocation3], 32  }
 0x214   :  { %296 = vsyncadd [#allocation3], 4294967264 }
 0x215   :  { %240 = vsyncpa [#allocation3], 1 }

</bundles_post_ra>
